<compile_context>
chip_gen: v7x
topology: tpu7x:2x2x1
jax: 0.10.0
libtpu: 0.0.40
codegen_flags: <defaults>
</compile_context>

<pallas_src>
import math
from functools import partial

import jax
import jax.numpy as jnp
from jax import lax
from jax.experimental import pallas as pl
from jax.experimental.pallas import tpu as pltpu

PAD = 0          # Vocab.PAD
EPS = 1e-6       # LayerNorm eps
NEG_INF = -1e18  # masked_fill value in the reference


# ----------------------------------------------------------------------------
# Small helpers
# ----------------------------------------------------------------------------
def _pick_row_blk(n, cap=512):
    """Largest power-of-two row tile (<= cap) dividing n; falls back to n."""
    for blk in (cap, 256, 128, 64, 32, 16, 8):
        if blk <= n and n % blk == 0:
            return blk
    return n


def _nb(shape, dtype):
    n = 1
    for s in shape:
        n *= int(s)
    return n * jnp.dtype(dtype).itemsize


def _cparams(semantics, block_bytes):
    """Explicit scoped-VMEM limit: 2x (double buffering) + headroom, clamped
    to v7x's 64 MiB physical VMEM."""
    limit = int(min(max(2 * block_bytes + (2 << 20), 8 << 20), 64 << 20))
    return pltpu.CompilerParams(dimension_semantics=semantics,
                                vmem_limit_bytes=limit)


def _layernorm_rows(x, gamma, beta):
    """NJUNMT LayerNorm: a_2 * (x - mean) / (std + eps) + b_2, unbiased std.
    Divide goes through the EUP (approx reciprocal)."""
    d = x.shape[-1]
    mean = jnp.mean(x, axis=-1, keepdims=True)
    var = jnp.sum((x - mean) ** 2, axis=-1, keepdims=True) * (1.0 / (d - 1))
    std = jnp.sqrt(var)
    return gamma * (x - mean) * pl.reciprocal(std + EPS, approx=True) + beta


# ----------------------------------------------------------------------------
# Row-slab kernels (LayerNorm + projection, FFN)
# ----------------------------------------------------------------------------
def ln_linear_kernel(x_ref, g_ref, b_ref, w_ref, bias_ref, o_ref):
    # fused pre-norm + projection:  LN(x) @ W + b   (bf16 MXU, f32 accumulate)
    ln = _layernorm_rows(x_ref[...], g_ref[...], b_ref[...]).astype(jnp.bfloat16)
    y = jnp.dot(ln, w_ref[...], preferred_element_type=jnp.float32) + bias_ref[...]
    o_ref[...] = y.astype(o_ref.dtype)


def ffn_kernel(x_ref, g_ref, bt_ref, w1_ref, b1_ref, w2_ref, b2_ref, o_ref):
    # PositionwiseFeedForward: w2(relu(w1(LN(x)))) + x
    x = x_ref[...]
    ln = _layernorm_rows(x, g_ref[...], bt_ref[...]).astype(jnp.bfloat16)
    h = jnp.dot(ln, w1_ref[...], preferred_element_type=jnp.float32) + b1_ref[...]
    h = jnp.maximum(h, 0.0).astype(jnp.bfloat16)
    y = jnp.dot(h, w2_ref[...], preferred_element_type=jnp.float32) + b2_ref[...]
    o_ref[...] = y + x


def ffn_out_ln_kernel(x_ref, g_ref, bt_ref, w1_ref, b1_ref, w2_ref, b2_ref,
                      og_ref, ob_ref, o_ref):
    # same as ffn_kernel but with the stack's final LayerNorm fused as epilogue
    x = x_ref[...]
    ln = _layernorm_rows(x, g_ref[...], bt_ref[...]).astype(jnp.bfloat16)
    h = jnp.dot(ln, w1_ref[...], preferred_element_type=jnp.float32) + b1_ref[...]
    h = jnp.maximum(h, 0.0).astype(jnp.bfloat16)
    y = jnp.dot(h, w2_ref[...], preferred_element_type=jnp.float32) + b2_ref[...]
    o_ref[...] = _layernorm_rows(y + x, og_ref[...], ob_ref[...])


# ----------------------------------------------------------------------------
# Attention kernels: one batch element per grid step, all heads inside,
# output projection + residual fused into the epilogue.
# ----------------------------------------------------------------------------
def _mha_heads_fused(q, k, v, bias, wo, acc, n_head, scale):
    """q (Tq,D), k/v (Tk,D); bias (Tq,Tk) additive mask; wo (D,D) bf16;
    acc (Tq,D) f32 pre-loaded with residual + out-proj bias.
    Per-head:  softmax(q_h k_h^T * scale + bias) v_h @ Wo[h]  accumulated."""
    D = q.shape[-1]
    dk = D // n_head
    qs = (q.astype(jnp.float32) * scale).astype(jnp.bfloat16)
    kb = k.astype(jnp.bfloat16)
    vb = v.astype(jnp.bfloat16)
    for h in range(n_head):                                   # static unroll
        sl = slice(h * dk, (h + 1) * dk)
        # contract d_k directly on the MXU (no k.T materialization)
        s = lax.dot_general(qs[:, sl], kb[:, sl], (((1,), (1,)), ((), ())),
                            preferred_element_type=jnp.float32)       # (Tq,Tk)
        s = s + bias
        s = s - jnp.max(s, axis=-1, keepdims=True)
        p = jnp.exp(s)
        p = p * pl.reciprocal(jnp.sum(p, axis=-1, keepdims=True), approx=True)
        ctx = jnp.dot(p.astype(jnp.bfloat16), vb[:, sl],
                      preferred_element_type=jnp.float32)              # (Tq,dk)
        # fused output projection: lane-dense (Tq, D) accumulation
        acc = acc + jnp.dot(ctx.astype(jnp.bfloat16), wo[sl, :],
                            preferred_element_type=jnp.float32)
    return acc


def self_attn_kernel(*refs, n_head, scale, causal):
    if causal:
        qkv_ref, pad_ref, cbias_ref, wo_ref, bo_ref, res_ref, o_ref = refs
    else:
        qkv_ref, pad_ref, wo_ref, bo_ref, res_ref, o_ref = refs
        cbias_ref = None
    qkv = qkv_ref[0]                              # (T, 3D) bf16
    T = qkv.shape[0]
    D = qkv.shape[-1] // 3
    q = qkv[:, :D]
    k = qkv[:, D:2 * D]
    v = qkv[:, 2 * D:]
    # additive mask bias, computed ONCE (not per head)
    bias = jnp.broadcast_to(pad_ref[0] * NEG_INF, (T, T))     # key-pad mask
    if causal:
        bias = bias + cbias_ref[...]                          # precomputed (T,T)
    acc = res_ref[0] + bo_ref[...]                            # residual + bo
    o_ref[0] = _mha_heads_fused(q, k, v, bias, wo_ref[...], acc, n_head, scale)


def cross_attn_kernel(q_ref, enc_ref, wkv_ref, bkv_ref, pad_ref, wo_ref, bo_ref,
                      res_ref, o_ref, *, n_head, scale):
    q = q_ref[0]                                  # (Tq, D) bf16 (projected query)
    enc = enc_ref[0]                              # (Tk, D) f32 (encoder output)
    D = q.shape[-1]
    Tq, Tk = q.shape[0], enc.shape[0]
    # fused K/V projection of enc_output (no HBM round trip)
    kv = jnp.dot(enc.astype(jnp.bfloat16), wkv_ref[...],
                 preferred_element_type=jnp.float32) + bkv_ref[...]   # (Tk, 2D)
    k = kv[:, :D]
    v = kv[:, D:]
    bias = jnp.broadcast_to(pad_ref[0] * NEG_INF, (Tq, Tk))
    acc = res_ref[0] + bo_ref[...]
    o_ref[0] = _mha_heads_fused(q, k, v, bias, wo_ref[...], acc, n_head, scale)


# ----------------------------------------------------------------------------
# pallas_call wrappers
# ----------------------------------------------------------------------------
def ln_linear(x2d, g, b, w, bias, out_dtype=jnp.float32):
    N, D = x2d.shape
    Dout = w.shape[1]
    rb = _pick_row_blk(N)
    bytes_est = (_nb((rb, D), x2d.dtype) + 2 * _nb((1, D), jnp.float32) +
                 _nb((D, Dout), w.dtype) + _nb((1, Dout), jnp.float32) +
                 _nb((rb, Dout), out_dtype))
    return pl.pallas_call(
        ln_linear_kernel,
        out_shape=jax.ShapeDtypeStruct((N, Dout), out_dtype),
        grid=(N // rb,),
        in_specs=[
            pl.BlockSpec((rb, D), lambda i: (i, 0)),
            pl.BlockSpec((1, D), lambda i: (0, 0)),
            pl.BlockSpec((1, D), lambda i: (0, 0)),
            pl.BlockSpec((D, Dout), lambda i: (0, 0)),
            pl.BlockSpec((1, Dout), lambda i: (0, 0)),
        ],
        out_specs=pl.BlockSpec((rb, Dout), lambda i: (i, 0)),
        compiler_params=_cparams(("parallel",), bytes_est),
    )(x2d, g, b, w, bias)


def ffn(x2d, p, out_ln=None):
    N, D = x2d.shape
    DH = p["w1"].shape[1]
    rb = _pick_row_blk(N)
    row = lambda i: (i, 0)
    cst = lambda i: (0, 0)
    in_specs = [
        pl.BlockSpec((rb, D), row),
        pl.BlockSpec((1, D), cst), pl.BlockSpec((1, D), cst),
        pl.BlockSpec((D, DH), cst), pl.BlockSpec((1, DH), cst),
        pl.BlockSpec((DH, D), cst), pl.BlockSpec((1, D), cst),
    ]
    args = [x2d, p["ffn_ln_g"], p["ffn_ln_b"], p["w1"], p["b1"], p["w2"], p["b2"]]
    bytes_est = (_nb((rb, D), jnp.float32) * 2 + 4 * _nb((1, D), jnp.float32) +
                 _nb((D, DH), p["w1"].dtype) + _nb((1, DH), jnp.float32) +
                 _nb((DH, D), p["w2"].dtype) + _nb((rb, DH), jnp.float32))
    if out_ln is None:
        kernel = ffn_kernel
    else:
        kernel = ffn_out_ln_kernel
        in_specs += [pl.BlockSpec((1, D), cst), pl.BlockSpec((1, D), cst)]
        args += [out_ln[0], out_ln[1]]
        bytes_est += 2 * _nb((1, D), jnp.float32)
    return pl.pallas_call(
        kernel,
        out_shape=jax.ShapeDtypeStruct((N, D), jnp.float32),
        grid=(N // rb,),
        in_specs=in_specs,
        out_specs=pl.BlockSpec((rb, D), row),
        compiler_params=_cparams(("parallel",), bytes_est),
    )(*args)


def self_attention_block(qkv3, pad3, cbias, wo, bo, res3, n_head, causal):
    B, T, D3 = qkv3.shape
    D = D3 // 3
    dk = D // n_head
    in_specs = [
        pl.BlockSpec((1, T, D3), lambda b: (b, 0, 0)),
        pl.BlockSpec((1, 1, T), lambda b: (b, 0, 0)),
    ]
    args = [qkv3, pad3]
    bytes_est = _nb((1, T, D3), qkv3.dtype) + _nb((1, 1, T), jnp.float32)
    if causal:
        in_specs.append(pl.BlockSpec((T, T), lambda b: (0, 0)))
        args.append(cbias)
        bytes_est += _nb((T, T), jnp.float32)
    in_specs += [
        pl.BlockSpec((D, D), lambda b: (0, 0)),        # wo (bf16, resident)
        pl.BlockSpec((1, D), lambda b: (0, 0)),        # bo
        pl.BlockSpec((1, T, D), lambda b: (b, 0, 0)),  # residual
    ]
    args += [wo, bo, res3]
    bytes_est += (_nb((D, D), wo.dtype) + _nb((1, D), jnp.float32) +
                  2 * _nb((1, T, D), jnp.float32))
    return pl.pallas_call(
        partial(self_attn_kernel, n_head=n_head,
                scale=1.0 / math.sqrt(dk), causal=causal),
        out_shape=jax.ShapeDtypeStruct((B, T, D), jnp.float32),
        grid=(B,),
        in_specs=in_specs,
        out_specs=pl.BlockSpec((1, T, D), lambda b: (b, 0, 0)),
        compiler_params=_cparams(("parallel",), bytes_est),
    )(*args)


def cross_attention_block(q3, enc3, w_kv, b_kv, pad3, wo, bo, res3, n_head):
    B, Tq, D = q3.shape
    Tk = enc3.shape[1]
    dk = D // n_head
    bytes_est = (_nb((1, Tq, D), q3.dtype) + _nb((1, Tk, D), enc3.dtype) +
                 _nb((D, 2 * D), w_kv.dtype) + _nb((1, 2 * D), jnp.float32) +
                 _nb((1, 1, Tk), jnp.float32) + _nb((D, D), wo.dtype) +
                 _nb((1, D), jnp.float32) + 2 * _nb((1, Tq, D), jnp.float32))
    return pl.pallas_call(
        partial(cross_attn_kernel, n_head=n_head, scale=1.0 / math.sqrt(dk)),
        out_shape=jax.ShapeDtypeStruct((B, Tq, D), jnp.float32),
        grid=(B,),
        in_specs=[
            pl.BlockSpec((1, Tq, D), lambda b: (b, 0, 0)),     # projected query
            pl.BlockSpec((1, Tk, D), lambda b: (b, 0, 0)),     # encoder output
            pl.BlockSpec((D, 2 * D), lambda b: (0, 0)),        # W_kv (bf16)
            pl.BlockSpec((1, 2 * D), lambda b: (0, 0)),        # b_kv
            pl.BlockSpec((1, 1, Tk), lambda b: (b, 0, 0)),     # enc key-pad
            pl.BlockSpec((D, D), lambda b: (0, 0)),            # Wo (bf16)
            pl.BlockSpec((1, D), lambda b: (0, 0)),            # bo
            pl.BlockSpec((1, Tq, D), lambda b: (b, 0, 0)),     # residual
        ],
        out_specs=pl.BlockSpec((1, Tq, D), lambda b: (b, 0, 0)),
        compiler_params=_cparams(("parallel",), bytes_est),
    )(q3, enc3, w_kv, b_kv, pad3, wo, bo, res3)


# ----------------------------------------------------------------------------
# Glue (plain JAX): embeddings + sinusoidal positional signal + causal bias
# ----------------------------------------------------------------------------
def positional_signal(length, channels, min_timescale=1.0, max_timescale=1.0e4):
    num_ts = channels // 2
    log_inc = math.log(float(max_timescale) / float(min_timescale)) / (float(num_ts) - 1.0)
    position = jnp.arange(length, dtype=jnp.float32)
    inv_ts = min_timescale * jnp.exp(jnp.arange(num_ts, dtype=jnp.float32) * -log_inc)
    scaled_time = position[:, None] * inv_ts[None, :]
    return jnp.concatenate([jnp.sin(scaled_time), jnp.cos(scaled_time)], axis=1)  # (S, D)


def embeddings(seq, emb_table):
    B, S = seq.shape
    D = emb_table.shape[1]
    emb = emb_table[seq] * math.sqrt(D)          # gather + scale (PAD row is zero)
    return emb + positional_signal(S, D)[None]   # dropout = identity (eval)


def make_causal_bias(T):
    row = jnp.arange(T, dtype=jnp.int32)[:, None]
    col = jnp.arange(T, dtype=jnp.int32)[None, :]
    return jnp.where(col > row, NEG_INF, 0.0).astype(jnp.float32)   # (T, T)


# ----------------------------------------------------------------------------
# Encoder / Decoder / Transformer forward
# ----------------------------------------------------------------------------
def encoder_forward(src_seq, params, n_layers, n_head):
    B, S = src_seq.shape
    D = params["emb"].shape[1]
    emb = embeddings(src_seq, params["emb"])                        # (B, S, D)
    pad3 = (src_seq == PAD).astype(jnp.float32)[:, None, :]         # (B, 1, S)

    out2d = emb.reshape(B * S, D)
    for i in range(n_layers):
        p = params["layers"][i]
        # fused pre-norm + Q/K/V projection (bf16 activation output)
        qkv2d = ln_linear(out2d, p["ln1_g"], p["ln1_b"], p["w_qkv"], p["b_qkv"],
                          out_dtype=jnp.bfloat16)
        # attention + out-proj + residual, fused
        out3 = self_attention_block(qkv2d.reshape(B, S, 3 * D), pad3, None,
                                    p["wo"], p["bo"], out2d.reshape(B, S, D),
                                    n_head, causal=False)
        out_ln = (params["ln_g"], params["ln_b"]) if i == n_layers - 1 else None
        out2d = ffn(out3.reshape(B * S, D), p, out_ln=out_ln)       # final LN fused
    return out2d.reshape(B, S, D), pad3


def decoder_forward(tgt_seq, enc_out3, enc_pad3, params, n_layers, n_head):
    B, T = tgt_seq.shape
    D = params["emb"].shape[1]
    emb = embeddings(tgt_seq, params["emb"])                        # (B, T, D)
    tgt_pad3 = (tgt_seq == PAD).astype(jnp.float32)[:, None, :]     # (B, 1, T)
    cbias = make_causal_bias(T)                                     # built once

    out2d = emb.reshape(B * T, D)
    for i in range(n_layers):
        p = params["layers"][i]
        # --- masked self-attention (causal + key-pad), out-proj fused ---
        qkv2d = ln_linear(out2d, p["ln1_g"], p["ln1_b"], p["w_qkv"], p["b_qkv"],
                          out_dtype=jnp.bfloat16)
        query3 = self_attention_block(qkv2d.reshape(B, T, 3 * D), tgt_pad3, cbias,
                                      p["wo_slf"], p["bo_slf"],
                                      out2d.reshape(B, T, D), n_head, causal=True)
        query2d = query3.reshape(B * T, D)
        # --- encoder-decoder attention (KV proj + out-proj fused) ---
        q2d = ln_linear(query2d, p["ln2_g"], p["ln2_b"], p["wq_ctx"], p["bq_ctx"],
                        out_dtype=jnp.bfloat16)
        x3 = cross_attention_block(q2d.reshape(B, T, D), enc_out3,
                                   p["w_kv_ctx"], p["b_kv_ctx"], enc_pad3,
                                   p["wo_ctx"], p["bo_ctx"], query3, n_head)
        # --- position-wise FFN (+ fused output LayerNorm on the last layer) ---
        out_ln = (params["ln_g"], params["ln_b"]) if i == n_layers - 1 else None
        out2d = ffn(x3.reshape(B * T, D), p, out_ln=out_ln)
    return out2d.reshape(B, T, D)


def transformer_forward(src_seq, tgt_seq, params, n_layers, n_head):
    """Transformer.forward(mode='train') == force_teaching: encoder -> decoder."""
    enc_out3, enc_pad3 = encoder_forward(src_seq, params["encoder"], n_layers, n_head)
    return decoder_forward(tgt_seq, enc_out3, enc_pad3,
                           params["decoder"], n_layers, n_head)
    # TODO(synk): Generator (Linear+LogSoftmax) and batch_beam_search (infer mode)
    #             are not part of the train-mode forward and are not implemented.


# ----------------------------------------------------------------------------
# Deterministic synthetic parameters (matmul weights stored in bf16; LN params,
# biases and embeddings stay f32; accumulation is always f32 in-kernel).
# ----------------------------------------------------------------------------
def _dense(key, din, dout):
    return (jax.random.normal(key, (din, dout), jnp.float32) * 0.05).astype(jnp.bfloat16)


def _ones(d):
    return jnp.ones((1, d), jnp.float32)


def _zeros(d):
    return jnp.zeros((1, d), jnp.float32)


def init_encoder_params(key, vocab, n_layers, d_model, d_inner):
    keys = jax.random.split(key, 1 + n_layers)
    emb = jax.random.normal(keys[0], (vocab, d_model), jnp.float32) * 0.05
    emb = emb.at[PAD].set(0.0)                                      # padding_idx
    layers = []
    for li in range(n_layers):
        lk = jax.random.split(keys[1 + li], 4)
        layers.append(dict(
            ln1_g=_ones(d_model), ln1_b=_zeros(d_model),
            w_qkv=_dense(lk[0], d_model, 3 * d_model), b_qkv=_zeros(3 * d_model),
            wo=_dense(lk[1], d_model, d_model), bo=_zeros(d_model),
            ffn_ln_g=_ones(d_model), ffn_ln_b=_zeros(d_model),
            w1=_dense(lk[2], d_model, d_inner), b1=_zeros(d_inner),
            w2=_dense(lk[3], d_inner, d_model), b2=_zeros(d_model),
        ))
    return dict(emb=emb, layers=layers, ln_g=_ones(d_model), ln_b=_zeros(d_model))


def init_decoder_params(key, vocab, n_layers, d_model, d_inner):
    keys = jax.random.split(key, 1 + n_layers)
    emb = jax.random.normal(keys[0], (vocab, d_model), jnp.float32) * 0.05
    emb = emb.at[PAD].set(0.0)
    layers = []
    for li in range(n_layers):
        lk = jax.random.split(keys[1 + li], 7)
        layers.append(dict(
            ln1_g=_ones(d_model), ln1_b=_zeros(d_model),
            w_qkv=_dense(lk[0], d_model, 3 * d_model), b_qkv=_zeros(3 * d_model),
            wo_slf=_dense(lk[1], d_model, d_model), bo_slf=_zeros(d_model),
            ln2_g=_ones(d_model), ln2_b=_zeros(d_model),
            wq_ctx=_dense(lk[2], d_model, d_model), bq_ctx=_zeros(d_model),
            w_kv_ctx=_dense(lk[3], d_model, 2 * d_model), b_kv_ctx=_zeros(2 * d_model),
            wo_ctx=_dense(lk[4], d_model, d_model), bo_ctx=_zeros(d_model),
            ffn_ln_g=_ones(d_model), ffn_ln_b=_zeros(d_model),
            w1=_dense(lk[5], d_model, d_inner), b1=_zeros(d_inner),
            w2=_dense(lk[6], d_inner, d_model), b2=_zeros(d_model),
        ))
    return dict(emb=emb, layers=layers, ln_g=_ones(d_model), ln_b=_zeros(d_model))


# ----------------------------------------------------------------------------
if __name__ == "__main__":
    B, S_SRC, S_TGT = 2, 8, 8
    V_SRC, V_TGT = 50, 56
    N_LAYERS, N_HEAD, D_MODEL, D_INNER = 2, 4, 32, 64
    assert D_MODEL % N_HEAD == 0 and (B * S_SRC) % 8 == 0 and (B * S_TGT) % 8 == 0

    key = jax.random.PRNGKey(0)
    k_src, k_tgt, k_enc, k_dec = jax.random.split(key, 4)
    src_seq = jax.random.randint(k_src, (B, S_SRC), 4, V_SRC, dtype=jnp.int32)
    src_seq = src_seq.at[1, -2:].set(PAD)            # exercise encoder pad mask
    tgt_seq = jax.random.randint(k_tgt, (B, S_TGT), 4, V_TGT, dtype=jnp.int32)
    tgt_seq = tgt_seq.at[0, -1].set(PAD)             # exercise decoder pad mask

    params = dict(
        encoder=init_encoder_params(k_enc, V_SRC, N_LAYERS, D_MODEL, D_INNER),
        decoder=init_decoder_params(k_dec, V_TGT, N_LAYERS, D_MODEL, D_INNER),
    )

    out = transformer_forward(src_seq, tgt_seq, params, N_LAYERS, N_HEAD)
    out = jax.block_until_ready(out)

    assert out.shape == (B, S_TGT, D_MODEL) and out.dtype == jnp.float32
    assert bool(jnp.all(jnp.isfinite(out)))
    print("KERNEL_OK")
</pallas_src>

<mosaic_0001>
module attributes {stable_mosaic.version = 11 : i64} {
  func.func @ln_linear_kernel(%arg0: i32, %arg1: memref<16x32xf32, #tpu.memory_space<vmem>>, %arg2: memref<1x32xf32, #tpu.memory_space<vmem>>, %arg3: memref<1x32xf32, #tpu.memory_space<vmem>>, %arg4: memref<32x96xbf16, #tpu.memory_space<vmem>>, %arg5: memref<1x96xf32, #tpu.memory_space<vmem>>, %arg6: memref<16x96xbf16, #tpu.memory_space<vmem>>) attributes {dimension_semantics = [#tpu.dimension_semantics<parallel>], iteration_bounds = array<i64: 1>, scalar_prefetch = 0 : i64, scratch_operands = 0 : i64, tpu.core_type = #tpu.core_type<tc>, window_params = [{transform_indices = @transform_0, window_bounds = array<i64: 16, 32>}, {pipeline_mode = #tpu.pipeline_mode<synchronous>, transform_indices = @transform_1, window_bounds = array<i64: 1, 32>}, {pipeline_mode = #tpu.pipeline_mode<synchronous>, transform_indices = @transform_2, window_bounds = array<i64: 1, 32>}, {pipeline_mode = #tpu.pipeline_mode<synchronous>, transform_indices = @transform_3, window_bounds = array<i64: 32, 96>}, {pipeline_mode = #tpu.pipeline_mode<synchronous>, transform_indices = @transform_4, window_bounds = array<i64: 1, 96>}, {transform_indices = @transform_5, window_bounds = array<i64: 16, 96>}]} {
    %c0 = arith.constant 0 : index
    %c0_0 = arith.constant 0 : index
    %0 = vector.load %arg1[%c0, %c0_0] : memref<16x32xf32, #tpu.memory_space<vmem>>, vector<16x32xf32>
    %c0_1 = arith.constant 0 : index
    %c0_2 = arith.constant 0 : index
    %1 = vector.load %arg2[%c0_1, %c0_2] : memref<1x32xf32, #tpu.memory_space<vmem>>, vector<1x32xf32>
    %c0_3 = arith.constant 0 : index
    %c0_4 = arith.constant 0 : index
    %2 = vector.load %arg3[%c0_3, %c0_4] : memref<1x32xf32, #tpu.memory_space<vmem>>, vector<1x32xf32>
    %cst = arith.constant dense<0.000000e+00> : vector<16xf32>
    %3 = vector.multi_reduction <add>, %0, %cst [1] : vector<16x32xf32> to vector<16xf32>
    %4 = vector.shape_cast %3 : vector<16xf32> to vector<16x1xf32>
    %cst_5 = arith.constant 3.200000e+01 : f32
    %5 = vector.broadcast %cst_5 : f32 to vector<16x1xf32>
    %6 = arith.divf %4, %5 : vector<16x1xf32>
    %7 = vector.broadcast %6 : vector<16x1xf32> to vector<16x32xf32>
    %8 = arith.subf %0, %7 : vector<16x32xf32>
    %9 = arith.mulf %8, %8 : vector<16x32xf32>
    %cst_6 = arith.constant dense<0.000000e+00> : vector<16xf32>
    %10 = vector.multi_reduction <add>, %9, %cst_6 [1] : vector<16x32xf32> to vector<16xf32>
    %11 = vector.shape_cast %10 : vector<16xf32> to vector<16x1xf32>
    %cst_7 = arith.constant 0.0322580636 : f32
    %12 = vector.broadcast %cst_7 : f32 to vector<16x1xf32>
    %13 = arith.mulf %11, %12 : vector<16x1xf32>
    %14 = math.sqrt %13 : vector<16x1xf32>
    %15 = vector.broadcast %6 : vector<16x1xf32> to vector<16x32xf32>
    %16 = arith.subf %0, %15 : vector<16x32xf32>
    %17 = vector.broadcast %1 : vector<1x32xf32> to vector<16x32xf32>
    %18 = arith.mulf %17, %16 : vector<16x32xf32>
    %cst_8 = arith.constant 9.99999997E-7 : f32
    %19 = vector.broadcast %cst_8 : f32 to vector<16x1xf32>
    %20 = arith.addf %14, %19 : vector<16x1xf32>
    %21 = tpu.reciprocal %20 {approx = true} : vector<16x1xf32> -> vector<16x1xf32>
    %22 = vector.broadcast %21 : vector<16x1xf32> to vector<16x32xf32>
    %23 = arith.mulf %18, %22 : vector<16x32xf32>
    %24 = vector.broadcast %2 : vector<1x32xf32> to vector<16x32xf32>
    %25 = arith.addf %23, %24 : vector<16x32xf32>
    %26 = arith.truncf %25 : vector<16x32xf32> to vector<16x32xbf16>
    %c0_9 = arith.constant 0 : index
    %c0_10 = arith.constant 0 : index
    %27 = vector.load %arg4[%c0_9, %c0_10] : memref<32x96xbf16, #tpu.memory_space<vmem>>, vector<32x96xbf16>
    %cst_11 = arith.constant dense<0.000000e+00> : vector<16x96xf32>
    %28 = tpu.matmul %26, %27, %cst_11 {dimension_numbers = #tpu.dot_dimension_numbers<[1], [0], [0], [1], [0, 0, 1, 1], [], []>} : vector<16x32xbf16>, vector<32x96xbf16>, vector<16x96xf32> -> vector<16x96xf32>
    %c0_12 = arith.constant 0 : index
    %c0_13 = arith.constant 0 : index
    %29 = vector.load %arg5[%c0_12, %c0_13] : memref<1x96xf32, #tpu.memory_space<vmem>>, vector<1x96xf32>
    %30 = vector.broadcast %29 : vector<1x96xf32> to vector<16x96xf32>
    %31 = arith.addf %28, %30 : vector<16x96xf32>
    %32 = arith.truncf %31 : vector<16x96xf32> to vector<16x96xbf16>
    %c0_14 = arith.constant 0 : index
    %c0_15 = arith.constant 0 : index
    %33 = vector.load %arg6[%c0_14, %c0_15] : memref<16x96xbf16, #tpu.memory_space<vmem>>, vector<16x96xbf16>
    tpu.vector_store %arg6[%c0_14, %c0_15], %32 {strides = array<i32>} : memref<16x96xbf16, #tpu.memory_space<vmem>>, vector<16x96xbf16>,
    return
  }
  func.func @transform_0(%arg0: i32) -> (i32, i32) {
    %c0_i32 = arith.constant 0 : i32
    %c0_i32_0 = arith.constant 0 : i32
    return %arg0, %c0_i32 : i32, i32
  }
  func.func @transform_1(%arg0: i32) -> (i32, i32) {
    %c0_i32 = arith.constant 0 : i32
    %c0_i32_0 = arith.constant 0 : i32
    %c0_i32_1 = arith.constant 0 : i32
    return %c0_i32, %c0_i32_0 : i32, i32
  }
  func.func @transform_2(%arg0: i32) -> (i32, i32) {
    %c0_i32 = arith.constant 0 : i32
    %c0_i32_0 = arith.constant 0 : i32
    %c0_i32_1 = arith.constant 0 : i32
    return %c0_i32, %c0_i32_0 : i32, i32
  }
  func.func @transform_3(%arg0: i32) -> (i32, i32) {
    %c0_i32 = arith.constant 0 : i32
    %c0_i32_0 = arith.constant 0 : i32
    %c0_i32_1 = arith.constant 0 : i32
    return %c0_i32, %c0_i32_0 : i32, i32
  }
  func.func @transform_4(%arg0: i32) -> (i32, i32) {
    %c0_i32 = arith.constant 0 : i32
    %c0_i32_0 = arith.constant 0 : i32
    %c0_i32_1 = arith.constant 0 : i32
    return %c0_i32, %c0_i32_0 : i32, i32
  }
  func.func @transform_5(%arg0: i32) -> (i32, i32) {
    %c0_i32 = arith.constant 0 : i32
    %c0_i32_0 = arith.constant 0 : i32
    return %arg0, %c0_i32 : i32, i32
  }
}

</mosaic_0001>

<bundles_post_ra>
// kernel: tpu_custom_call.1
= control target key start
LH: loop header
LB: loop body
LE: loop exit
PB: predicated region body
PF: predicated region fallthrough
CT: control target
= control target key end

     0   :  { %10 = vsyncpa [#allocation3], 0  ;;  %s416_s0 = inlined_call_operand.hbm [shape: f32[16,32], index: 0, kind: input, shape index: {}]   ;;  %s417_s1 = inlined_call_operand.vmem [shape: f32[1,32], index: 1, kind: input, shape index: {}]   ;;  %s418_s2 = inlined_call_operand.vmem [shape: f32[1,32], index: 2, kind: input, shape index: {}]   ;;  %s419_s3 = inlined_call_operand.hbm [shape: bf16[32,96], index: 3, kind: input, shape index: {}]   ;;  %s420_s4 = inlined_call_operand.vmem [shape: f32[1,96], index: 4, kind: input, shape index: {}]   ;;  %s421_s5 = inlined_call_operand.hbm [shape: bf16[16,96], index: 5, kind: output, shape index: {}]  }
   0x1   :  { %11 = vsyncpa [#allocation6], 0 }
   0x2   :  { %12 = vsyncpa [#allocation4], 0  ;;  %s321_s18 = smov [#allocation2]   ;;  %s249_s22 = scalar_lea.hbm %s416_s0, 256 }
   0x3   :  { %s18_s19 = sshll.u32 %s321_s18, 4  ;;  %p250_p0 = scmp.ne.s32.totalorder %s416_s0, %s249_s22  ;;  %s19_s19 = int_to_ptr.vmem [resolvable:$true] %s18_s19 }
   0x4   :  { %p253_p1 = scmp.lt.u32.totalorder %s249_s22, %s416_s0 }
   0x6   :  { %p255_p2 = pnand %p253_p1, %p250_p0 }
   0x8   :  { %258 = shalt.err (!%p255_p2)
}
   0x9   :  { %s259_s27 = scalar_lea.vmem %s19_s19, 256  ;;  %p264_p4 = scmp.lt.s32.totalorder %s19_s19, %s19_s19 }
   0xa   :  { %p260_p3 = scmp.ne.s32.totalorder %s19_s19, %s259_s27  ;;  %p265_p5 = scmp.lt.s32.totalorder %s259_s27, %s259_s27 }
   0xc   :  { %p266_p6 = por %p265_p5, %p264_p4 }
   0xe   :  { %p267_p7 = pnand %p266_p6, %p260_p3 }
  0x10   :  { %270 = shalt.err (!%p267_p7)
}
  0x11   :  { %s322_s28 = smov 128   ;;  %s323_s29 = smov 8  }
  0x12   :  { %24 = dma.hbm_to_vmem [thread:$0]  %s416_s0, 256, %s19_s19, [#allocation3], %s322_s28, %s322_s28, %s323_s29  }
  0x13   :  { %s324_s7 = smov [#allocation5]   ;;  %s271_s11 = scalar_lea.hbm %s419_s3, 256 }
  0x14   :  { %s34_s8 = sshll.u32 %s324_s7, 4  ;;  %p272_p8 = scmp.ne.s32.totalorder %s419_s3, %s271_s11  ;;  %s35_s8 = int_to_ptr.vmem [resolvable:$true] %s34_s8 }
  0x15   :  { %p275_p9 = scmp.lt.u32.totalorder %s271_s11, %s419_s3 }
  0x17   :  { %p277_p10 = pnand %p275_p9, %p272_p8 }
  0x19   :  { %280 = shalt.err (!%p277_p10)
}
  0x1a   :  { %s281_s16 = scalar_lea.vmem %s35_s8, 256  ;;  %p286_p12 = scmp.lt.s32.totalorder %s35_s8, %s35_s8 }
  0x1b   :  { %p282_p11 = scmp.ne.s32.totalorder %s35_s8, %s281_s16  ;;  %p287_p13 = scmp.lt.s32.totalorder %s281_s16, %s281_s16 }
  0x1d   :  { %p288_p0 = por %p287_p13, %p286_p12 }
  0x1f   :  { %p289_p1 = pnand %p288_p0, %p282_p11 }
  0x21   :  { %292 = shalt.err (!%p289_p1)
}
  0x22   :  { %s325_s0 = smov 64   ;;  %s326_s17 = smov 4  }
  0x23   :  { %40 = dma.hbm_to_vmem [thread:$0]  %s419_s3, 256, %s35_s8, [#allocation6], %s325_s0, %s325_s0, %s326_s17  }
  0x24   :  { %315 = dma.done.wait [#allocation3], 256  }
  0x25   :  { %316 = vsyncadd [#allocation3], 4294967040 }
  0x26   :  { %317 = dma.done.wait [#allocation6], 256  }
  0x27   :  { %318 = vsyncadd [#allocation6], 4294967040  ;;  %vm54_vm0 = vcmask 261120   ;;  %v50_v0 = vld [vmem:[#allocation2] sm:$0xff]  ;;  %v51_v1 = vld [vmem:[#allocation2 + $0x8] sm:$0xff]  ;;  %v327_v15 = vmov 0.0  }
  0x28   :  { %v55_v2 = vsel %vm54_vm0, %v50_v0, 0.0  ;;  %v58_v3 = vsel %vm54_vm0, %v51_v1, 0.0  ;;  %v239_v14 = vld [vmem:[#allocation5] sm:$0xff]   ;;  %222 = vmatprep.subr.bf16.mxu0 %v327_v15  ;;  %vm328_vm1 = vmmov 0   ;;  %v240_v16 = vld [vmem:[#allocation5 + $0x8] sm:$0xff]   ;;  %vm188_vm6 = vcmask 781312  }
  0x29   :  { %56 = vadd.xlane.f32.xlu0 %v55_v2  ;;  %226 = vmatprep.mubr.msk.bf16.mxu0 %vm328_vm1, %v327_v15  ;;  %v209_v33 = vld [vmem:[%s417_s1] ss:$0 sm:$0xff]  ;;  %s329_s1 = smov [#allocation7]  }
  0x2a   :  { %223 = vmatpush3.bf16.msra.mxu0 %v239_v14  ;;  %v210_v39 = vld [vmem:[%s418_s2] ss:$0 sm:$0xff]  ;;  %s196_s25 = sshll.u32 %s329_s1, 4  ;;  %s197_s25 = int_to_ptr.vmem [resolvable:$true] %s196_s25 }
  0x2b   :  { %224 = vmatprep.subr.bf16.mxu0 %v327_v15  ;;  %v211_v44 = vld [vmem:[%s420_s4] ss:$0 sm:$0xff]  ;;  %s293_s2 = scalar_lea.vmem %s197_s25, 128  ;;  %p298_p3 = scmp.lt.s32.totalorder %s197_s25, %s197_s25 }
  0x2c   :  { %p294_p2 = scmp.ne.s32.totalorder %s197_s25, %s293_s2  ;;  %p299_p4 = scmp.lt.s32.totalorder %s293_s2, %s293_s2 }
  0x2d   :  { %59 = vadd.xlane.f32.xlu0 %v58_v3 }
  0x2e   :  { %225 = vmatpush3.bf16.msra.mxu0 %v240_v16  ;;  %p300_p5 = por %p299_p4, %p298_p3 }
  0x30   :  { %p301_p6 = pnand %p300_p5, %p294_p2 }
  0xb6   :  { %v57_v4 = vpop.xlane.xlu0 %56 }
  0xb7   :  { %v62_v5 = vmul.f32 0.03125, %v57_v4 }
  0xb9   :  { %v64_v6 = vsub.f32 %v50_v0, %v62_v5 }
  0xba   :  { %v60_v7 = vpop.xlane.xlu0 %59 }
  0xbb   :  { %v63_v8 = vmul.f32 0.03125, %v60_v7  ;;  %v66_v9 = vmul.f32 %v64_v6, %v64_v6  ;;  %v96_v35 = vmul.f32 %v209_v33, %v64_v6 }
  0xbd   :  { %v65_v10 = vsub.f32 %v51_v1, %v63_v8  ;;  %v68_v11 = vsel %vm54_vm0, %v66_v9, 0.0 }
  0xbe   :  { %69 = vadd.xlane.f32.xlu1 %v68_v11 }
  0xbf   :  { %v67_v12 = vmul.f32 %v65_v10, %v65_v10  ;;  %v97_v36 = vmul.f32 %v209_v33, %v65_v10 }
  0xc1   :  { %v71_v13 = vsel %vm54_vm0, %v67_v12, 0.0 }
  0xc2   :  { %72 = vadd.xlane.f32.xlu1 %v71_v13 }
 0x14b   :  { %v70_v17 = vpop.xlane.xlu1 %69 }
 0x14c   :  { %v74_v18 = vmul.f32 0.032258064, %v70_v17 }
 0x14e   :  { %241 = vrsqrt.f32 %v74_v18  ;;  %vm78_vm2 = vcmp.eq.f32.partialorder %v74_v18, inf  ;;  %v81_v23 = vand.u32 2147483648, %v74_v18  ;;  %vm80_vm3 = vcmp.eq.f32.partialorder %v74_v18, 0.0 }
 0x14f   :  { %v73_v19 = vpop.xlane.xlu1 %72 }
 0x150   :  { %v75_v20 = vmul.f32 0.032258064, %v73_v19 }
 0x152   :  { %243 = vrsqrt.f32 %v75_v20  ;;  %vm85_vm4 = vcmp.eq.f32.partialorder %v75_v20, inf  ;;  %v88_v29 = vand.u32 2147483648, %v75_v20  ;;  %vm87_vm5 = vcmp.eq.f32.partialorder %v75_v20, 0.0 }
 0x158   :  { %v242_v21 = vpop.eup %241 }
 0x159   :  { %v77_v22 = vmul.f32 %v242_v21, %v74_v18 }
 0x15b   :  { %v79_v24 = vsel %vm78_vm2, %v74_v18, %v77_v22 }
 0x15c   :  { %v244_v25 = vpop.eup %243  ;;  %v82_v26 = vsel %vm80_vm3, %v81_v23, %v79_v24 }
 0x15d   :  { %v98_v27 = vadd.f32 1e-06, %v82_v26  ;;  %v84_v28 = vmul.f32 %v244_v25, %v75_v20 }
 0x15f   :  { %245 = vrcp.f32 %v98_v27  ;;  %v86_v30 = vsel %vm85_vm4, %v75_v20, %v84_v28 }
 0x160   :  { %v89_v31 = vsel %vm87_vm5, %v88_v29, %v86_v30 }
 0x161   :  { %v99_v32 = vadd.f32 1e-06, %v89_v31 }
 0x163   :  { %247 = vrcp.f32 %v99_v32 }
 0x169   :  { %v246_v34 = vpop.eup %245 }
 0x16a   :  { %v102_v37 = vmul.f32 %v246_v34, %v96_v35 }
 0x16c   :  { %v110_v41 = vadd.f32 %v210_v39, %v102_v37 }
 0x16d   :  { %v248_v38 = vpop.eup %247 }
 0x16e   :  { %v103_v40 = vmul.f32 %v248_v38, %v97_v36 }
 0x170   :  { %v111_v42 = vadd.f32 %v210_v39, %v103_v40 }
 0x172   :  { %v112_v43 = vpack.c.bf16 %v111_v42, %v110_v41 }
 0x174   :  { %227 = vmatmul.mubr.msk.bf16.vlgmr.msra.gmra.mrb[0].mxu0 %vm54_vm0, %v112_v43 }
 0x247   :  { %v173_v45 = vpop.f32.mrb[0].mxu0 }
 0x248   :  { %v174_v46 = vadd.f32 %v211_v44, %v173_v45  ;;  %v228_v47 = vpop.f32.mrb[1].mxu0 }
 0x249   :  { %v176_v48 = vpop.f32.mrb[2].mxu0 }
 0x24a   :  { %v217_v49 = vpack.c.bf16 %v174_v46, %v174_v46  ;;  %v177_v50 = vadd.f32 %v211_v44, %v176_v48  ;;  %v229_v51 = vpop.f32.mrb[3].mxu0 }
 0x24c   :  { %v218_v52 = vpack.c.bf16 %v177_v50, %v177_v50  ;;  %189 = vst.msk [vmem:[#allocation7] sm:$0xf] %vm188_vm6, %v217_v49 }
 0x24e   :  { %190 = vst.msk [vmem:[#allocation7 + $0x4] sm:$0xf] %vm188_vm6, %v218_v52 }
 0x24f   :  { %304 = shalt.err (!%p301_p6)
}
 0x250   :  { %s305_s27 = scalar_lea.hbm %s421_s5, 128 }
 0x251   :  { %p306_p7 = scmp.ne.s32.totalorder %s421_s5, %s305_s27  ;;  %p309_p8 = scmp.lt.u32.totalorder %s305_s27, %s421_s5 }
 0x253   :  { %p311_p9 = pnand %p309_p8, %p306_p7 }
 0x255   :  { %314 = shalt.err (!%p311_p9)
}
 0x256   :  { %202 = dma.vmem_to_hbm [thread:$0]  %s197_s25, 128, %s421_s5, [#allocation4], %s325_s0, %s325_s0, %s326_s17  }
 0x257   :  { %319 = dma.done.wait [#allocation4], 128  }
 0x258   :  { %320 = vsyncadd [#allocation4], 4294967168 }
 0x259   :  { %206 = vsyncpa [#allocation3], 1 }
 0x25a   :  { %207 = vsyncpa [#allocation6], 1 }
 0x25b   :  { %208 = vsyncpa [#allocation4], 1 }

</bundles_post_ra>
